<compile_context>
chip_gen: v6e
topology: v6e:2x2x1
jax: 0.10.0
libtpu: 0.0.40
codegen_flags: <defaults>
</compile_context>

<pallas_src>
import functools
import math

import jax
import jax.numpy as jnp
from jax.experimental import pallas as pl
from jax.experimental.pallas import tpu as pltpu


def _attention_kernel(w_ref, b_ref, bias_ref, q_ref, k_ref, v_ref, o_ref, *,
                      compute_dtype):
    """One grid step == B batch elements, fully resident in VMEM.

    Refs:
      w_ref:    (3, D, D)  stacked, pre-transposed weights [Wq^T*scale, Wk^T, Wv^T]
                (already cast to compute_dtype in the wrapper)
      b_ref:    (3, 1, D)  stacked biases (f32; bq already scaled by 1/sqrt(D))
      bias_ref: (S, T)     additive mask bias, already -1e9 * (1 - mask)
      q_ref:    (B, S, D)
      k_ref, v_ref: (B, T, D)
      o_ref:    (B, S, D)
    """
    B, S, D = q_ref.shape
    T = k_ref.shape[1]
    cd = compute_dtype

    # Leading-dim reshapes only (layout-preserving; S, T are sublane multiples).
    qf = q_ref[...].reshape(B * S, D).astype(cd)
    kf = k_ref[...].reshape(B * T, D).astype(cd)
    vf = v_ref[...].reshape(B * T, D).astype(cd)

    # Projections: x @ W (+ b). Weights already (in, out) and pre-cast; the
    # 1/sqrt(D) scale is folded into w_ref[0] / b_ref[0]. f32 accumulation.
    qp = (jnp.dot(qf, w_ref[0], preferred_element_type=jnp.float32)
          + b_ref[0]).reshape(B, S, D)
    kp = (jnp.dot(kf, w_ref[1], preferred_element_type=jnp.float32)
          + b_ref[1]).reshape(B, T, D)
    vp = (jnp.dot(vf, w_ref[2], preferred_element_type=jnp.float32)
          + b_ref[2]).reshape(B, T, D)

    # Scaled dot-product (scale pre-folded): contract D directly, no k transpose.
    scores = jax.lax.dot_general(
        qp.astype(cd), kp.astype(cd),
        dimension_numbers=(((2,), (2,)), ((0,), (0,))),
        preferred_element_type=jnp.float32)                  # (B, S, T)

    # Pre-computed additive mask bias (broadcast over the batch dim).
    scores = scores + bias_ref[...]

    # Numerically stable softmax over T (f32); reciprocal on the EUP.
    m = jnp.max(scores, axis=-1, keepdims=True)
    e = jnp.exp(scores - m)
    denom = jnp.sum(e, axis=-1, keepdims=True)
    attn = e * pl.reciprocal(denom, approx=True)

    # Weighted sum of values: (B, S, T) x (B, T, D) -> (B, S, D).
    y = jax.lax.dot_general(
        attn.astype(cd), vp.astype(cd),
        dimension_numbers=(((2,), (1,)), ((0,), (0,))),
        preferred_element_type=jnp.float32)
    o_ref[...] = y.astype(o_ref.dtype)


def _ceil_to(x, m):
    return -(-x // m) * m


def _vmem_bytes_per_batch_elem(S, T, D, in_itemsize, out_itemsize):
    """Conservative per-batch-element VMEM footprint (bytes).

    Accounts for lane padding (D -> multiple of 128), sublane padding
    (S/T -> multiple of 8), BlockSpec double-buffering of the pipelined
    q/k/v/o tiles, and the f32 intermediates (qp/kp/vp, scores/e/attn).
    """
    d_pad = _ceil_to(D, 128)
    t_pad = _ceil_to(T, 128)
    s_sub = _ceil_to(S, 8)
    t_sub = _ceil_to(T, 8)
    # Double-buffered pipelined I/O tiles.
    io = 2 * ((s_sub + 2 * t_sub) * d_pad * in_itemsize
              + s_sub * d_pad * out_itemsize)
    # f32 intermediates (generously counted; compiler may reuse some).
    interm = 2 * (s_sub + 2 * t_sub) * d_pad * 4 + 3 * s_sub * t_pad * 4
    return io + interm


def _min_grid_steps():
    """>=2 grid steps only on dual-TensorCore chips (v7x); 1 elsewhere."""
    try:
        kind = jax.devices()[0].device_kind.lower()
    except Exception:  # pragma: no cover - defensive
        return 1
    return 2 if "v7" in kind else 1


def _pick_batch_block(N, S, T, D, in_itemsize, out_itemsize,
                      vmem_budget_bytes, min_grid):
    """Largest divisor of N whose per-step footprint fits the VMEM budget."""
    per_elem = _vmem_bytes_per_batch_elem(S, T, D, in_itemsize, out_itemsize)
    cap = max(1, vmem_budget_bytes // max(1, per_elem))
    cap = min(cap, max(1, N // max(1, min_grid)), N)
    for b in range(cap, 0, -1):
        if N % b == 0:
            return b
    return 1


def attention_layer(query, key, value, params, attn_mask=None, *,
                    compute_dtype=jnp.bfloat16, batch_block=None,
                    vmem_budget_bytes=24 * 1024 * 1024,
                    vmem_limit_bytes=48 * 1024 * 1024):
    """Pallas forward pass of AttentionLayer (eval mode).

    query: (N, S, D); key/value: (N, T, D); attn_mask: (S, T) or None.
    params: dict with wq, bq, wk, bk, wv, bv (PyTorch nn.Linear layout).
    compute_dtype: bf16 (default) runs all matmul operands through the MXU at
      its native bf16 rate with f32 accumulation; pass jnp.float32 to match
      the PyTorch module's numerics bit-for-bit (modulo approx reciprocal).
    """
    N, S, D = query.shape
    _, T, _ = value.shape
    assert key.shape == value.shape
    # Keep the in-kernel (B,S,D)<->(B*S,D) reshapes layout-preserving.
    assert S % 8 == 0 and T % 8 == 0, "S and T must be sublane (8) multiples"
    # TODO(synk): pad S/T in the wrapper instead of asserting, if ever needed.

    in_itemsize = jnp.dtype(query.dtype).itemsize
    out_itemsize = in_itemsize
    min_grid = _min_grid_steps()
    B = batch_block if batch_block is not None else _pick_batch_block(
        N, S, T, D, in_itemsize, out_itemsize, vmem_budget_bytes, min_grid)
    assert N % B == 0, "batch block must divide N"
    grid_n = N // B

    # Hoisted out of the per-step hot path:
    #   - weights transposed once to (in, out), 1/sqrt(D) folded into Wq,
    #     pre-cast to compute_dtype, stacked -> single operand
    #   - biases stacked (bq scaled) -> single operand
    #   - additive mask bias precomputed
    scale = jnp.float32(1.0 / math.sqrt(D))
    w_all = jnp.stack([params["wq"].T * scale,
                       params["wk"].T,
                       params["wv"].T]).astype(compute_dtype)      # (3, D, D)
    b_all = jnp.stack([params["bq"] * scale,
                       params["bk"],
                       params["bv"]]).astype(jnp.float32).reshape(3, 1, D)
    if attn_mask is None:
        mask_bias = jnp.zeros((S, T), jnp.float32)
    else:
        mask_bias = (attn_mask.astype(jnp.float32) - 1.0) * 1e9

    kernel = functools.partial(_attention_kernel, compute_dtype=compute_dtype)

    return pl.pallas_call(
        kernel,
        out_shape=jax.ShapeDtypeStruct((N, S, D), query.dtype),
        grid_spec=pltpu.PrefetchScalarGridSpec(
            num_scalar_prefetch=0,
            grid=(grid_n,),
            in_specs=[
                pl.BlockSpec((3, D, D), lambda n: (0, 0, 0)),   # stacked W^T
                pl.BlockSpec((3, 1, D), lambda n: (0, 0, 0)),   # stacked biases
                pl.BlockSpec((S, T),    lambda n: (0, 0)),      # mask bias
                pl.BlockSpec((B, S, D), lambda n: (n, 0, 0)),   # query
                pl.BlockSpec((B, T, D), lambda n: (n, 0, 0)),   # key
                pl.BlockSpec((B, T, D), lambda n: (n, 0, 0)),   # value
            ],
            out_specs=pl.BlockSpec((B, S, D), lambda n: (n, 0, 0)),
        ),
        compiler_params=pltpu.CompilerParams(
            dimension_semantics=("parallel",),
            vmem_limit_bytes=vmem_limit_bytes),
    )(w_all, b_all, mask_bias, query, key, value)


def _reference(query, key, value, params, attn_mask=None):
    """Pure-JAX reference mirroring the PyTorch forward (eval mode)."""
    D = query.shape[-1]
    q = query @ params["wq"].T + params["bq"]
    k = key @ params["wk"].T + params["bk"]
    v = value @ params["wv"].T + params["bv"]
    s = jnp.einsum("nsd,ntd->nst", q, k) / jnp.sqrt(jnp.float32(D))
    if attn_mask is not None:
        s = s + (-1e9) * (1.0 - attn_mask.astype(jnp.float32))
    a = jax.nn.softmax(s, axis=-1)
    return jnp.einsum("nst,ntd->nsd", a, v)


def _run_case(root_key, N, S, T, D, compute_dtype, atol, rtol):
    ks = jax.random.split(root_key, 10)
    scale = 1.0 / math.sqrt(D)
    params = {
        "wq": jax.random.uniform(ks[0], (D, D), jnp.float32, -scale, scale),
        "bq": jax.random.uniform(ks[1], (D,), jnp.float32, -scale, scale),
        "wk": jax.random.uniform(ks[2], (D, D), jnp.float32, -scale, scale),
        "bk": jax.random.uniform(ks[3], (D,), jnp.float32, -scale, scale),
        "wv": jax.random.uniform(ks[4], (D, D), jnp.float32, -scale, scale),
        "bv": jax.random.uniform(ks[5], (D,), jnp.float32, -scale, scale),
    }
    query = jax.random.normal(ks[6], (N, S, D), jnp.float32)
    key = jax.random.normal(ks[7], (N, T, D), jnp.float32)
    value = jax.random.normal(ks[8], (N, T, D), jnp.float32)
    attn_mask = jnp.tril(jnp.ones((S, T), jnp.float32))   # causal (S, T)

    out = attention_layer(query, key, value, params, attn_mask,
                          compute_dtype=compute_dtype)
    out = jax.block_until_ready(out)
    ref = _reference(query, key, value, params, attn_mask)

    assert out.shape == (N, S, D)
    assert jnp.allclose(out, ref, atol=atol, rtol=rtol), (
        f"mismatch vs reference (N={N}, compute_dtype={compute_dtype})")


if __name__ == "__main__":
    root = jax.random.PRNGKey(0)
    k0, k1 = jax.random.split(root)
    # f32-compute path: numerics match the PyTorch module (tight tolerance).
    _run_case(k0, N=2, S=8, T=8, D=32, compute_dtype=jnp.float32,
              atol=2e-3, rtol=2e-3)
    # Default bf16 MXU-operand path over a larger batch (exercises the
    # VMEM-derived batch-block / grid tiling); looser tolerance.
    _run_case(k1, N=8, S=8, T=8, D=32, compute_dtype=jnp.bfloat16,
              atol=3e-2, rtol=3e-2)
    print("KERNEL_OK")
</pallas_src>

<mosaic_0001>
module attributes {stable_mosaic.version = 11 : i64} {
  func.func @_attention_kernel(%arg0: i32, %arg1: memref<3x32x32xf32, #tpu.memory_space<vmem>>, %arg2: memref<3x1x32xf32, #tpu.memory_space<vmem>>, %arg3: memref<8x8xf32, #tpu.memory_space<vmem>>, %arg4: memref<2x8x32xf32, #tpu.memory_space<vmem>>, %arg5: memref<2x8x32xf32, #tpu.memory_space<vmem>>, %arg6: memref<2x8x32xf32, #tpu.memory_space<vmem>>, %arg7: memref<2x8x32xf32, #tpu.memory_space<vmem>>) attributes {dimension_semantics = [#tpu.dimension_semantics<parallel>], iteration_bounds = array<i64: 1>, scalar_prefetch = 0 : i64, scratch_operands = 0 : i64, tpu.core_type = #tpu.core_type<tc>, window_params = [{pipeline_mode = #tpu.pipeline_mode<synchronous>, transform_indices = @transform_0, window_bounds = array<i64: 3, 32, 32>}, {pipeline_mode = #tpu.pipeline_mode<synchronous>, transform_indices = @transform_1, window_bounds = array<i64: 3, 1, 32>}, {pipeline_mode = #tpu.pipeline_mode<synchronous>, transform_indices = @transform_2, window_bounds = array<i64: 8, 8>}, {transform_indices = @transform_3, window_bounds = array<i64: 2, 8, 32>}, {transform_indices = @transform_4, window_bounds = array<i64: 2, 8, 32>}, {transform_indices = @transform_5, window_bounds = array<i64: 2, 8, 32>}, {transform_indices = @transform_6, window_bounds = array<i64: 2, 8, 32>}]} {
    %c0 = arith.constant 0 : index
    %c0_0 = arith.constant 0 : index
    %c0_1 = arith.constant 0 : index
    %0 = vector.load %arg4[%c0, %c0_0, %c0_1] : memref<2x8x32xf32, #tpu.memory_space<vmem>>, vector<2x8x32xf32>
    %1 = vector.shape_cast %0 : vector<2x8x32xf32> to vector<16x32xf32>
    %c0_2 = arith.constant 0 : index
    %c0_3 = arith.constant 0 : index
    %c0_4 = arith.constant 0 : index
    %2 = vector.load %arg5[%c0_2, %c0_3, %c0_4] : memref<2x8x32xf32, #tpu.memory_space<vmem>>, vector<2x8x32xf32>
    %3 = vector.shape_cast %2 : vector<2x8x32xf32> to vector<16x32xf32>
    %c0_5 = arith.constant 0 : index
    %c0_6 = arith.constant 0 : index
    %c0_7 = arith.constant 0 : index
    %4 = vector.load %arg6[%c0_5, %c0_6, %c0_7] : memref<2x8x32xf32, #tpu.memory_space<vmem>>, vector<2x8x32xf32>
    %5 = vector.shape_cast %4 : vector<2x8x32xf32> to vector<16x32xf32>
    %c0_8 = arith.constant 0 : index
    %c0_9 = arith.constant 0 : index
    %c0_10 = arith.constant 0 : index
    %6 = vector.load %arg1[%c0_8, %c0_9, %c0_10] : memref<3x32x32xf32, #tpu.memory_space<vmem>>, vector<1x32x32xf32>
    %7 = vector.shape_cast %6 : vector<1x32x32xf32> to vector<32x32xf32>
    %cst = arith.constant dense<0.000000e+00> : vector<16x32xf32>
    %8 = tpu.matmul %1, %7, %cst {dimension_numbers = #tpu.dot_dimension_numbers<[1], [0], [0], [1], [0, 0, 1, 1], [], []>} : vector<16x32xf32>, vector<32x32xf32>, vector<16x32xf32> -> vector<16x32xf32>
    %c0_11 = arith.constant 0 : index
    %c0_12 = arith.constant 0 : index
    %c0_13 = arith.constant 0 : index
    %9 = vector.load %arg2[%c0_11, %c0_12, %c0_13] : memref<3x1x32xf32, #tpu.memory_space<vmem>>, vector<1x1x32xf32>
    %10 = vector.shape_cast %9 : vector<1x1x32xf32> to vector<1x32xf32>
    %11 = vector.broadcast %10 : vector<1x32xf32> to vector<16x32xf32>
    %12 = arith.addf %8, %11 : vector<16x32xf32>
    %13 = vector.shape_cast %12 : vector<16x32xf32> to vector<2x8x32xf32>
    %c1 = arith.constant 1 : index
    %c0_14 = arith.constant 0 : index
    %c0_15 = arith.constant 0 : index
    %14 = vector.load %arg1[%c1, %c0_14, %c0_15] : memref<3x32x32xf32, #tpu.memory_space<vmem>>, vector<1x32x32xf32>
    %15 = vector.shape_cast %14 : vector<1x32x32xf32> to vector<32x32xf32>
    %cst_16 = arith.constant dense<0.000000e+00> : vector<16x32xf32>
    %16 = tpu.matmul %3, %15, %cst_16 {dimension_numbers = #tpu.dot_dimension_numbers<[1], [0], [0], [1], [0, 0, 1, 1], [], []>} : vector<16x32xf32>, vector<32x32xf32>, vector<16x32xf32> -> vector<16x32xf32>
    %c1_17 = arith.constant 1 : index
    %c0_18 = arith.constant 0 : index
    %c0_19 = arith.constant 0 : index
    %17 = vector.load %arg2[%c1_17, %c0_18, %c0_19] : memref<3x1x32xf32, #tpu.memory_space<vmem>>, vector<1x1x32xf32>
    %18 = vector.shape_cast %17 : vector<1x1x32xf32> to vector<1x32xf32>
    %19 = vector.broadcast %18 : vector<1x32xf32> to vector<16x32xf32>
    %20 = arith.addf %16, %19 : vector<16x32xf32>
    %21 = vector.shape_cast %20 : vector<16x32xf32> to vector<2x8x32xf32>
    %c2 = arith.constant 2 : index
    %c0_20 = arith.constant 0 : index
    %c0_21 = arith.constant 0 : index
    %22 = vector.load %arg1[%c2, %c0_20, %c0_21] : memref<3x32x32xf32, #tpu.memory_space<vmem>>, vector<1x32x32xf32>
    %23 = vector.shape_cast %22 : vector<1x32x32xf32> to vector<32x32xf32>
    %cst_22 = arith.constant dense<0.000000e+00> : vector<16x32xf32>
    %24 = tpu.matmul %5, %23, %cst_22 {dimension_numbers = #tpu.dot_dimension_numbers<[1], [0], [0], [1], [0, 0, 1, 1], [], []>} : vector<16x32xf32>, vector<32x32xf32>, vector<16x32xf32> -> vector<16x32xf32>
    %c2_23 = arith.constant 2 : index
    %c0_24 = arith.constant 0 : index
    %c0_25 = arith.constant 0 : index
    %25 = vector.load %arg2[%c2_23, %c0_24, %c0_25] : memref<3x1x32xf32, #tpu.memory_space<vmem>>, vector<1x1x32xf32>
    %26 = vector.shape_cast %25 : vector<1x1x32xf32> to vector<1x32xf32>
    %27 = vector.broadcast %26 : vector<1x32xf32> to vector<16x32xf32>
    %28 = arith.addf %24, %27 : vector<16x32xf32>
    %29 = vector.shape_cast %28 : vector<16x32xf32> to vector<2x8x32xf32>
    %cst_26 = arith.constant dense<0.000000e+00> : vector<2x8x8xf32>
    %30 = tpu.matmul %13, %21, %cst_26 {dimension_numbers = #tpu.dot_dimension_numbers<[2], [2], [1], [1], [0, 0, 0, 1, 1, 1], [0], [0]>} : vector<2x8x32xf32>, vector<2x8x32xf32>, vector<2x8x8xf32> -> vector<2x8x8xf32>
    %c0_27 = arith.constant 0 : index
    %c0_28 = arith.constant 0 : index
    %31 = vector.load %arg3[%c0_27, %c0_28] : memref<8x8xf32, #tpu.memory_space<vmem>>, vector<8x8xf32>
    %32 = vector.shape_cast %31 : vector<8x8xf32> to vector<1x8x8xf32>
    %33 = vector.broadcast %32 : vector<1x8x8xf32> to vector<2x8x8xf32>
    %34 = arith.addf %30, %33 : vector<2x8x8xf32>
    %cst_29 = arith.constant dense<0xFF800000> : vector<2x8xf32>
    %35 = vector.multi_reduction <maximumf>, %34, %cst_29 [2] : vector<2x8x8xf32> to vector<2x8xf32>
    %36 = vector.shape_cast %35 : vector<2x8xf32> to vector<2x8x1xf32>
    %37 = vector.broadcast %36 : vector<2x8x1xf32> to vector<2x8x8xf32>
    %38 = arith.subf %34, %37 : vector<2x8x8xf32>
    %39 = math.exp %38 : vector<2x8x8xf32>
    %cst_30 = arith.constant dense<0.000000e+00> : vector<2x8xf32>
    %40 = vector.multi_reduction <add>, %39, %cst_30 [2] : vector<2x8x8xf32> to vector<2x8xf32>
    %41 = vector.shape_cast %40 : vector<2x8xf32> to vector<2x8x1xf32>
    %42 = tpu.reciprocal %41 {approx = true} : vector<2x8x1xf32> -> vector<2x8x1xf32>
    %43 = vector.broadcast %42 : vector<2x8x1xf32> to vector<2x8x8xf32>
    %44 = arith.mulf %39, %43 : vector<2x8x8xf32>
    %cst_31 = arith.constant dense<0.000000e+00> : vector<2x8x32xf32>
    %45 = tpu.matmul %44, %29, %cst_31 {dimension_numbers = #tpu.dot_dimension_numbers<[2], [1], [1], [2], [0, 0, 0, 1, 1, 2], [0], [0]>} : vector<2x8x8xf32>, vector<2x8x32xf32>, vector<2x8x32xf32> -> vector<2x8x32xf32>
    %c0_32 = arith.constant 0 : index
    %c0_33 = arith.constant 0 : index
    %c0_34 = arith.constant 0 : index
    %46 = vector.load %arg7[%c0_32, %c0_33, %c0_34] : memref<2x8x32xf32, #tpu.memory_space<vmem>>, vector<2x8x32xf32>
    tpu.vector_store %arg7[%c0_32, %c0_33, %c0_34], %45 {strides = array<i32>} : memref<2x8x32xf32, #tpu.memory_space<vmem>>, vector<2x8x32xf32>,
    return
  }
  func.func @transform_0(%arg0: i32) -> (i32, i32, i32) {
    %c0_i32 = arith.constant 0 : i32
    %c0_i32_0 = arith.constant 0 : i32
    %c0_i32_1 = arith.constant 0 : i32
    %c0_i32_2 = arith.constant 0 : i32
    return %c0_i32, %c0_i32_0, %c0_i32_1 : i32, i32, i32
  }
  func.func @transform_1(%arg0: i32) -> (i32, i32, i32) {
    %c0_i32 = arith.constant 0 : i32
    %c0_i32_0 = arith.constant 0 : i32
    %c0_i32_1 = arith.constant 0 : i32
    %c0_i32_2 = arith.constant 0 : i32
    return %c0_i32, %c0_i32_0, %c0_i32_1 : i32, i32, i32
  }
  func.func @transform_2(%arg0: i32) -> (i32, i32) {
    %c0_i32 = arith.constant 0 : i32
    %c0_i32_0 = arith.constant 0 : i32
    %c0_i32_1 = arith.constant 0 : i32
    return %c0_i32, %c0_i32_0 : i32, i32
  }
  func.func @transform_3(%arg0: i32) -> (i32, i32, i32) {
    %c0_i32 = arith.constant 0 : i32
    %c0_i32_0 = arith.constant 0 : i32
    %c0_i32_1 = arith.constant 0 : i32
    return %arg0, %c0_i32, %c0_i32_0 : i32, i32, i32
  }
  func.func @transform_4(%arg0: i32) -> (i32, i32, i32) {
    %c0_i32 = arith.constant 0 : i32
    %c0_i32_0 = arith.constant 0 : i32
    %c0_i32_1 = arith.constant 0 : i32
    return %arg0, %c0_i32, %c0_i32_0 : i32, i32, i32
  }
  func.func @transform_5(%arg0: i32) -> (i32, i32, i32) {
    %c0_i32 = arith.constant 0 : i32
    %c0_i32_0 = arith.constant 0 : i32
    %c0_i32_1 = arith.constant 0 : i32
    return %arg0, %c0_i32, %c0_i32_0 : i32, i32, i32
  }
  func.func @transform_6(%arg0: i32) -> (i32, i32, i32) {
    %c0_i32 = arith.constant 0 : i32
    %c0_i32_0 = arith.constant 0 : i32
    %c0_i32_1 = arith.constant 0 : i32
    return %arg0, %c0_i32, %c0_i32_0 : i32, i32, i32
  }
}

</mosaic_0001>

<bundles_post_ra>
// kernel: tpu_custom_call.1
= control target key start
LH: loop header
LB: loop body
LE: loop exit
PB: predicated region body
PF: predicated region fallthrough
CT: control target
= control target key end

     0   :  { %11 = vsyncpa [#allocation3], 0  ;;  %s1106_s0 = inlined_call_operand.hbm [shape: f32[3,32,32], index: 0, kind: input, shape index: {}]   ;;  %s1107_s1 = inlined_call_operand.hbm [shape: f32[3,1,32], index: 1, kind: input, shape index: {}]   ;;  %s1108_s2 = inlined_call_operand.hbm [shape: f32[8,8], index: 2, kind: input, shape index: {}]   ;;  %s1109_s3 = inlined_call_operand.hbm [shape: f32[2,8,32], index: 3, kind: input, shape index: {}]   ;;  %s1110_s4 = inlined_call_operand.hbm [shape: f32[2,8,32], index: 4, kind: input, shape index: {}]   ;;  %s1111_s5 = inlined_call_operand.hbm [shape: f32[2,8,32], index: 5, kind: input, shape index: {}]   ;;  %s1112_s6 = inlined_call_operand.hbm [shape: f32[2,8,32], index: 6, kind: output, shape index: {}]  }
   0x1   :  { %12 = vsyncpa [#allocation6], 0 }
   0x2   :  { %13 = vsyncpa [#allocation9], 0 }
   0x3   :  { %14 = vsyncpa [#allocation12], 0 }
   0x4   :  { %15 = vsyncpa [#allocation4], 0  ;;  %s1000_s21 = smov [#allocation5]  }
   0x5   :  { %s33_s22 = sshll.u32 %s1000_s21, 4  ;;  %s34_s22 = int_to_ptr.vmem [resolvable:$true] %s33_s22 }
   0x6   :  { %s858_s23 = scalar_lea.vmem %s34_s22, 48  ;;  %s862_s24 = scalar_lea.vmem %s34_s22, 64 }
   0x7   :  { %p859_p0 = scmp.ne.s32.totalorder %s34_s22, %s858_s23  ;;  %p863_p1 = scmp.lt.s32.totalorder %s34_s22, %s34_s22 }
   0x8   :  { %p864_p2 = scmp.lt.s32.totalorder %s862_s24, %s858_s23 }
   0xa   :  { %p865_p3 = por %p864_p2, %p863_p1 }
   0xc   :  { %p866_p4 = pnand %p865_p3, %p859_p0 }
   0xe   :  { %869 = shalt.err (!%p866_p4)
}
   0xf   :  { %s1001_s25 = smov 16   ;;  %s1002_s26 = smov 1  }
  0x10   :  { %39 = dma.hbm_to_vmem [thread:$0]  %s1107_s1, 48, %s34_s22, [#allocation6], %s1001_s25, %s1001_s25, %s1002_s26  }
  0x11   :  { %s1003_s29 = smov [#allocation8]   ;;  %s1004_s7 = smov [#allocation2]  }
  0x12   :  { %s55_s30 = sshll.u32 %s1003_s29, 4  ;;  %s21_s8 = sshll.u32 %s1004_s7, 4  ;;  %s56_s30 = int_to_ptr.vmem [resolvable:$true] %s55_s30  ;;  %s22_s8 = int_to_ptr.vmem [resolvable:$true] %s21_s8 }
  0x13   :  { %s878_s9 = scalar_lea.vmem %s56_s30, 256  ;;  %p883_p6 = scmp.lt.s32.totalorder %s56_s30, %s56_s30 }
  0x14   :  { %p879_p5 = scmp.ne.s32.totalorder %s56_s30, %s878_s9  ;;  %p884_p7 = scmp.lt.s32.totalorder %s878_s9, %s878_s9 }
  0x16   :  { %p885_p8 = por %p884_p7, %p883_p6 }
  0x18   :  { %p886_p9 = pnand %p885_p8, %p879_p5 }
  0x1a   :  { %889 = shalt.err (!%p886_p9)
}
  0x1b   :  { %s1005_s10 = smov 128   ;;  %s1006_s11 = smov 8  }
  0x1c   :  { %61 = dma.hbm_to_vmem [thread:$0]  %s1109_s3, 256, %s56_s30, [#allocation9], %s1005_s10, %s1005_s10, %s1006_s11  }
  0x1d   :  { %s898_s1 = scalar_lea.vmem %s22_s8, 1536  ;;  %p903_p11 = scmp.lt.s32.totalorder %s22_s8, %s22_s8 }
  0x1e   :  { %p899_p10 = scmp.ne.s32.totalorder %s22_s8, %s898_s1  ;;  %p904_p12 = scmp.lt.s32.totalorder %s898_s1, %s898_s1 }
  0x20   :  { %p905_p13 = por %p904_p12, %p903_p11 }
  0x22   :  { %p906_p0 = pnand %p905_p13, %p899_p10 }
  0x24   :  { %909 = shalt.err (!%p906_p0)
}
  0x25   :  { %27 = dma.hbm_to_vmem [thread:$0]  %s1106_s0, 1536, %s22_s8, [#allocation3], %s1005_s10, %s1005_s10, %s1006_s11  }
  0x26   :  { %s1007_s16 = smov [#allocation7]   ;;  %s1008_s18 = smov [#allocation10]  }
  0x27   :  { %s46_s17 = sshll.u32 %s1007_s16, 4  ;;  %s67_s3 = sshll.u32 %s1008_s18, 4  ;;  %s47_s17 = int_to_ptr.vmem [resolvable:$true] %s46_s17  ;;  %s68_s3 = int_to_ptr.vmem [resolvable:$true] %s67_s3 }
  0x28   :  { %s918_s19 = scalar_lea.vmem %s47_s17, 128  ;;  %p923_p2 = scmp.lt.s32.totalorder %s47_s17, %s47_s17 }
  0x29   :  { %p919_p1 = scmp.ne.s32.totalorder %s47_s17, %s918_s19  ;;  %p924_p3 = scmp.lt.s32.totalorder %s918_s19, %s918_s19 }
  0x2b   :  { %p925_p4 = por %p924_p3, %p923_p2 }
  0x2d   :  { %p926_p5 = pnand %p925_p4, %p919_p1 }
  0x2f   :  { %929 = shalt.err (!%p926_p5)
}
  0x30   :  { %49 = dma.hbm_to_vmem [thread:$0]  %s1108_s2, 128, %s47_s17, [#allocation6]  }
  0x31   :  { %s938_s22 = scalar_lea.vmem %s68_s3, 256  ;;  %p943_p7 = scmp.lt.s32.totalorder %s68_s3, %s68_s3 }
  0x32   :  { %p939_p6 = scmp.ne.s32.totalorder %s68_s3, %s938_s22  ;;  %p944_p8 = scmp.lt.s32.totalorder %s938_s22, %s938_s22 }
  0x34   :  { %p945_p9 = por %p944_p8, %p943_p7 }
  0x36   :  { %p946_p10 = pnand %p945_p9, %p939_p6 }
  0x38   :  { %949 = shalt.err (!%p946_p10)
}
  0x39   :  { %73 = dma.hbm_to_vmem [thread:$0]  %s1110_s4, 256, %s68_s3, [#allocation9], %s1005_s10, %s1005_s10, %s1006_s11  }
  0x3a   :  { %s1009_s24 = smov [#allocation11]  }
  0x3b   :  { %s79_s25 = sshll.u32 %s1009_s24, 4  ;;  %s80_s25 = int_to_ptr.vmem [resolvable:$true] %s79_s25 }
  0x3c   :  { %s958_s26 = scalar_lea.vmem %s80_s25, 256  ;;  %p963_p12 = scmp.lt.s32.totalorder %s80_s25, %s80_s25 }
  0x3d   :  { %p959_p11 = scmp.ne.s32.totalorder %s80_s25, %s958_s26  ;;  %p964_p13 = scmp.lt.s32.totalorder %s958_s26, %s958_s26 }
  0x3f   :  { %p965_p0 = por %p964_p13, %p963_p12 }
  0x41   :  { %p966_p1 = pnand %p965_p0, %p959_p11 }
  0x43   :  { %969 = shalt.err (!%p966_p1)
}
  0x44   :  { %85 = dma.hbm_to_vmem [thread:$0]  %s1111_s5, 256, %s80_s25, [#allocation12], %s1005_s10, %s1005_s10, %s1006_s11  }
  0x45   :  { %990 = dma.done.wait [#allocation3], 1536  }
  0x46   :  { %991 = vsyncadd [#allocation3], 4294965760 }
  0x47   :  { %992 = dma.done.wait [#allocation6], 176  }
  0x48   :  { %993 = vsyncadd [#allocation6], 4294967120 }
  0x49   :  { %994 = dma.done.wait [#allocation9], 512  }
  0x4a   :  { %995 = vsyncadd [#allocation9], 4294966784 }
  0x4b   :  { %996 = dma.done.wait [#allocation12], 256  }
  0x4c   :  { %997 = vsyncadd [#allocation12], 4294967040  ;;  %v207_v0 = vld [vmem:[#allocation2 + $0x38] sm:$0xff]  ;;  %v206_v2 = vld [vmem:[#allocation2 + $0x30] sm:$0xff]  ;;  %vm121_vm0 = vcmask 261120   ;;  %v1010_v12 = vmov 0.0  }
  0x4d   :  { %v113_v1 = vld [vmem:[#allocation2 + $0x18] sm:$0xff]  ;;  %787 = vmatprep.subr.mxu1 %v207_v0  ;;  %v112_v3 = vld [vmem:[#allocation2 + $0x10] sm:$0xff]  ;;  %v205_v4 = vld [vmem:[#allocation2 + $0x28] sm:$0xff]  ;;  %vm1011_vm1 = vmmov 0   ;;  %vm544_vm2 = vcmask 64512   ;;  %s1012_s4 = smov [#allocation13]  }
  0x4e   :  { %776 = vmatprep.subr.mxu0 %v113_v1  ;;  %788 = vmatpush3.msra.mxu1 %v207_v0  ;;  %v111_v5 = vld [vmem:[#allocation2 + $0x8] sm:$0xff]  ;;  %v204_v6 = vld [vmem:[#allocation2 + $0x20] sm:$0xff]  ;;  %v105_v11 = vld [vmem:[#allocation8 + $0x8] sm:$0xff]  ;;  %s720_s5 = sshll.u32 %s1012_s4, 4  ;;  %s721_s5 = int_to_ptr.vmem [resolvable:$true] %s720_s5 }
  0x4f   :  { %777 = vmatpush3.msra.mxu0 %v113_v1  ;;  %789 = vmatprep.subr.mxu1 %v206_v2  ;;  %v106_v7 = vld [vmem:[#allocation10] sm:$0xff]  ;;  %v107_v9 = vld [vmem:[#allocation10 + $0x8] sm:$0xff]  ;;  %v104_v10 = vld [vmem:[#allocation8] sm:$0xff]  ;;  %s970_s28 = scalar_lea.vmem %s721_s5, 256  ;;  %p975_p3 = scmp.lt.s32.totalorder %s721_s5, %s721_s5 }
  0x50   :  { %778 = vmatprep.subr.mxu0 %v112_v3  ;;  %790 = vmatpush3.msra.mxu1 %v206_v2  ;;  %v110_v8 = vld [vmem:[#allocation2] sm:$0xff]  ;;  %v301_v23 = vld [vmem:[#allocation2 + $0x58] sm:$0xff]  ;;  %v300_v24 = vld [vmem:[#allocation2 + $0x50] sm:$0xff]  ;;  %p971_p2 = scmp.ne.s32.totalorder %s721_s5, %s970_s28  ;;  %p976_p4 = scmp.lt.s32.totalorder %s970_s28, %s970_s28 }
  0x51   :  { %779 = vmatpush3.msra.mxu0 %v112_v3  ;;  %791 = vmatprep.subr.mxu1 %v205_v4  ;;  %v738_v14 = vld [vmem:[#allocation5 + $0x1] ss:$0 sm:$0xff]  ;;  %v735_v17 = vld [vmem:[#allocation5] ss:$0 sm:$0xff]  ;;  %v108_v25 = vld [vmem:[#allocation11] sm:$0xff] }
  0x52   :  { %780 = vmatprep.subr.mxu0 %v111_v5  ;;  %792 = vmatpush3.msra.mxu1 %v205_v4  ;;  %v299_v26 = vld [vmem:[#allocation2 + $0x48] sm:$0xff]  ;;  %v298_v27 = vld [vmem:[#allocation2 + $0x40] sm:$0xff]  ;;  %v109_v28 = vld [vmem:[#allocation11 + $0x8] sm:$0xff]  ;;  %p977_p5 = por %p976_p4, %p975_p3 }
  0x53   :  { %781 = vmatpush3.msra.mxu0 %v111_v5  ;;  %793 = vmatprep.subr.mxu1 %v204_v6  ;;  %v391_v29 = vld [vmem:[#allocation7] sm:$0xff]  ;;  %v741_v49 = vld [vmem:[#allocation5 + $0x2] ss:$0 sm:$0xff] }
  0x54   :  { %795 = vmatprep.mubr.msk.f32.mxu1 %vm121_vm0, %v106_v7  ;;  %794 = vmatpush3.msra.mxu1 %v204_v6  ;;  %p978_p6 = pnand %p977_p5, %p971_p2 }
  0x55   :  { %782 = vmatprep.subr.mxu0 %v110_v8  ;;  %796 = vmatmul.mubr.msk.f32.vlgmr.msra.gmra.mxu1 %vm121_vm0, %v107_v9 }
  0x56   :  { %783 = vmatpush3.msra.mxu0 %v110_v8  ;;  %784 = vmatprep.mubr.msk.f32.mxu0 %vm121_vm0, %v104_v10 }
  0x57   :  { %785 = vmatmul.mubr.msk.f32.vlgmr.msra.gmra.mxu0 %vm121_vm0, %v105_v11  ;;  %809 = vmatprep.subr.mxu1 %v1010_v12 }
  0x58   :  { %811 = vmatprep.mubr.msk.f32.mxu1 %vm1011_vm1, %v1010_v12  ;;  %798 = vmatprep.subr.mxu0 %v301_v23 }
  0x59   :  { %799 = vmatpush3.msra.mxu0 %v301_v23  ;;  %806 = vmatprep.mubr.msk.f32.mxu0 %vm121_vm0, %v108_v25 }
  0x5a   :  { %800 = vmatprep.subr.mxu0 %v300_v24 }
  0x5b   :  { %801 = vmatpush3.msra.mxu0 %v300_v24 }
  0x5c   :  { %802 = vmatprep.subr.mxu0 %v299_v26 }
  0x5d   :  { %803 = vmatpush3.msra.mxu0 %v299_v26 }
  0x5e   :  { %804 = vmatprep.subr.mxu0 %v298_v27 }
  0x5f   :  { %805 = vmatpush3.msra.mxu0 %v298_v27 }
  0x60   :  { %807 = vmatmul.mubr.msk.f32.vlgmr.msra.gmra.mxu0 %vm121_vm0, %v109_v28  ;;  %819 = vmatprep.subr.mxu0 %v1010_v12 }
  0x61   :  { %821 = vmatprep.mubr.msk.f32.mxu0 %vm1011_vm1, %v1010_v12 }
 0x115   :  { %v797_v13 = vpop.f32.mrf.mxu1 }
 0x116   :  { %v294_v21 = vadd.f32 %v797_v13, %v738_v14 }
 0x117   :  { %v786_v15 = vpop.f32.mrf.mxu0  ;;  %v288_v16 = vpop.f32.mrf.mxu1 }
 0x118   :  { %v289_v18 = vadd.f32 %v738_v14, %v288_v16  ;;  %v200_v22 = vadd.f32 %v786_v15, %v735_v17 }
 0x119   :  { %v194_v19 = vpop.f32.mrf.mxu0 }
 0x11a   :  { %810 = vmatpush3.xpose.msk.msra.mxu1 %vm121_vm0, %v289_v18  ;;  %v195_v20 = vadd.f32 %v735_v17, %v194_v19 }
 0x11b   :  { %814 = vmatprep.subr.mxu1 %v1010_v12 }
 0x11d   :  { %812 = vmatmul.mubr.msk.f32.vlgmr.msra.gmra.mxu1 %vm121_vm0, %v195_v20 }
 0x11e   :  { %815 = vmatpush3.xpose.msk.msra.mxu1 %vm121_vm0, %v294_v21  ;;  %816 = vmatprep.mubr.msk.f32.mxu1 %vm1011_vm1, %v1010_v12 }
 0x11f   :  { %824 = vmatprep.subr.mxu1 %v1010_v12 }
 0x120   :  { %v808_v48 = vpop.f32.mrf.mxu0 }
 0x121   :  { %817 = vmatmul.mubr.msk.f32.vlgmr.msra.gmra.mxu1 %vm121_vm0, %v200_v22  ;;  %v388_v50 = vadd.f32 %v808_v48, %v741_v49 }
 0x122   :  { %826 = vmatprep.mubr.msk.f32.mxu1 %vm1011_vm1, %v1010_v12  ;;  %v382_v51 = vpop.f32.mrf.mxu0 }
 0x123   :  { %v383_v52 = vadd.f32 %v741_v49, %v382_v51  ;;  %825 = vmatpush3.msra.mxu1 %v388_v50 }
 0x125   :  { %820 = vmatpush3.msra.mxu0 %v383_v52 }
 0x1dd   :  { %v464_v30 = vpop.f32.mrf.mxu1 }
 0x1de   :  { %v465_v31 = vadd.f32 %v464_v30, %v391_v29 }
 0x1df   :  { %v813_v32 = vpop.f32.mrf.mxu1 }
 0x1e0   :  { %v545_v33 = vsel %vm544_vm2, %v465_v31, -inf }
 0x1e1   :  { %546 = vmax.xlane.f32.xlu0 %v545_v33  ;;  %v540_v34 = vpop.f32.mrf.mxu1 }
 0x1e2   :  { %v541_v35 = vadd.f32 %v540_v34, %v391_v29 }
 0x1e3   :  { %v818_v36 = vpop.f32.mrf.mxu1 }
 0x1e4   :  { %v548_v37 = vsel %vm544_vm2, %v541_v35, -inf }
 0x1e5   :  { %549 = vmax.xlane.f32.xlu0 %v548_v37 }
 0x26a   :  { %v547_v38 = vpop.xlane.xlu0 %546 }
 0x26b   :  { %v551_v39 = vsub.f32 %v465_v31, %v547_v38 }
 0x26d   :  { %v553_v40 = vmul.f32 1.442695, %v551_v39 }
 0x26e   :  { %v550_v41 = vpop.xlane.xlu0 %549 }
 0x26f   :  { %842 = vpow2.f32 %v553_v40  ;;  %v552_v42 = vsub.f32 %v541_v35, %v550_v41 }
 0x271   :  { %v555_v43 = vmul.f32 1.442695, %v552_v42 }
 0x273   :  { %844 = vpow2.f32 %v555_v43 }
 0x27c   :  { %v843_v44 = vpop.eup %842 }
 0x27d   :  { %v557_v45 = vsel %vm544_vm2, %v843_v44, 0.0 }
 0x27e   :  { %558 = vadd.xlane.f32.xlu1 %v557_v45 }
 0x280   :  { %v845_v46 = vpop.eup %844 }
 0x281   :  { %v560_v47 = vsel %vm544_vm2, %v845_v46, 0.0 }
 0x282   :  { %561 = vadd.xlane.f32.xlu1 %v560_v47 }
 0x307   :  { %v559_v53 = vpop.xlane.xlu1 %558 }
 0x308   :  { %846 = vrcp.f32 %v559_v53 }
 0x30b   :  { %v562_v54 = vpop.xlane.xlu1 %561 }
 0x30c   :  { %848 = vrcp.f32 %v562_v54 }
 0x315   :  { %v847_v55 = vpop.eup %846 }
 0x316   :  { %v565_v56 = vmul.f32 %v847_v55, %v843_v44 }
 0x318   :  { %822 = vmatmul.mubr.msk.f32.vlgmr.msra.gmra.mxu0 %vm544_vm2, %v565_v56 }
 0x319   :  { %v849_v57 = vpop.eup %848 }
 0x31a   :  { %v566_v58 = vmul.f32 %v849_v57, %v845_v46 }
 0x31c   :  { %827 = vmatmul.mubr.msk.f32.vlgmr.msra.gmra.mxu1 %vm544_vm2, %v566_v58 }
 0x3d8   :  { %v636_v59 = vpop.f32.mrf.mxu0 }
 0x3d9   :  { %713 = vst.msk [vmem:[#allocation13] sm:$0xff] %vm121_vm0, %v636_v59 }
 0x3da   :  { %v823_v60 = vpop.f32.mrf.mxu0 }
 0x3dc   :  { %v709_v61 = vpop.f32.mrf.mxu1 }
 0x3dd   :  { %714 = vst.msk [vmem:[#allocation13 + $0x8] sm:$0xff] %vm121_vm0, %v709_v61 }
 0x3de   :  { %v828_v62 = vpop.f32.mrf.mxu1 }
 0x3df   :  { %981 = shalt.err (!%p978_p6)
}
 0x3e0   :  { %726 = dma.vmem_to_hbm [thread:$0]  %s721_s5, 256, %s1112_s6, [#allocation4], %s1005_s10, %s1005_s10, %s1006_s11  }
 0x3e1   :  { %998 = dma.done.wait [#allocation4], 256  }
 0x3e2   :  { %999 = vsyncadd [#allocation4], 4294967040 }
 0x3e3   :  { %730 = vsyncpa [#allocation3], 1 }
 0x3e4   :  { %731 = vsyncpa [#allocation6], 1 }
 0x3e5   :  { %732 = vsyncpa [#allocation9], 1 }
 0x3e6   :  { %733 = vsyncpa [#allocation12], 1 }
 0x3e7   :  { %734 = vsyncpa [#allocation4], 1 }

</bundles_post_ra>
